<compile_context>
chip_gen: v7x
topology: tpu7x:2x2x1
jax: 0.10.0
libtpu: 0.0.40
codegen_flags: <defaults>
</compile_context>

<pallas_src>
import math
import functools

import jax
import jax.numpy as jnp
from jax.experimental import pallas as pl
from jax.experimental.pallas import tpu as pltpu


# ----------------------------------------------------------------------------
# Kernel: one batch element per grid step.
#   attention RMSNorm -> fused [K | K·P | V] projection -> K rotary (VPU only) ->
#   per-head bf16 attention -> single concatenated o @ wo -> residual ->
#   ffn RMSNorm -> fused SwiGLU FFN -> residual
# ----------------------------------------------------------------------------
def transformer_block_kernel(x_ref, q_ref, cos_ref, sin_ref,
                             anw_ref, fnw_ref, wkv_ref, wo_ref, w13_ref, w2_ref,
                             out_ref, *, H, Dh, hidden, eps):
    D = H * Dh
    x = x_ref[...]                                            # (S, D) f32

    # ---- attention_norm (RMSNorm, f32) ----
    ms = jnp.mean(x * x, axis=-1, keepdims=True)
    xn = x * jax.lax.rsqrt(ms + eps) * anw_ref[...]           # (S, D)

    # ---- fused K / K-pair-swapped / V projection (bf16 MXU, f32 accumulation) ----
    kv = jnp.dot(xn.astype(wkv_ref.dtype), wkv_ref[...],
                 preferred_element_type=jnp.float32)          # (S, 3D)

    # ---- K rotary: pair-swap already folded into the weights, pure VPU here ----
    cos = cos_ref[...]                                        # (S, D)
    sin = sin_ref[...]                                        # (S, D)
    k_rot = kv[:, :D] * cos + kv[:, D:2 * D] * sin            # (S, D) f32
    xv = kv[:, 2 * D:]                                        # (S, D) f32

    # Q arrives with rotary AND the 1/sqrt(Dh) score scale pre-applied, already bf16.
    q_b = q_ref[...]                                          # (S, D) bf16
    k_b = k_rot.astype(jnp.bfloat16)
    v_b = xv.astype(jnp.bfloat16)

    # ---- per-head attention, bf16 MXU operands, f32 softmax ----
    contract_last = (((1,), (1,)), ((), ()))                  # 'qd,kd->qk'
    o_heads = []
    # TODO(synk): at production S (>=1024) bound the live ranges (lax.fori_loop over heads
    # with pl.ds / KV-chunked online softmax) so H overlapping (S,S) f32 score tiles do not
    # blow v7x's 64 MiB VMEM; fine at toy S.
    for h in range(H):
        lo = h * Dh
        q_h = q_b[:, lo:lo + Dh]                              # (S, Dh) bf16
        k_h = k_b[:, lo:lo + Dh]
        v_h = v_b[:, lo:lo + Dh]

        s_h = jax.lax.dot_general(q_h, k_h, contract_last,
                                  preferred_element_type=jnp.float32)   # (S, S) f32
        s_h = s_h - jnp.max(s_h, axis=-1, keepdims=True)
        p_h = jnp.exp(s_h)                                    # f32, EUP
        p_h = p_h * pl.reciprocal(jnp.sum(p_h, axis=-1, keepdims=True), approx=True)

        o_heads.append(jnp.dot(p_h.astype(jnp.bfloat16), v_h,
                               preferred_element_type=jnp.float32))      # (S, Dh) f32

    # ---- single concatenated output projection ----
    o_cat = jnp.concatenate(o_heads, axis=-1)                 # (S, D) f32
    attn = jnp.dot(o_cat.astype(wo_ref.dtype), wo_ref[...],
                   preferred_element_type=jnp.float32)        # (S, D) f32

    h_res = x + attn                                          # (S, D) f32

    # ---- ffn_norm (RMSNorm, f32) ----
    ms2 = jnp.mean(h_res * h_res, axis=-1, keepdims=True)
    hn = h_res * jax.lax.rsqrt(ms2 + eps) * fnw_ref[...]

    # ---- SwiGLU FFN with fused w1/w3 (bf16 MXU, f32 accumulation) ----
    a13 = jnp.dot(hn.astype(w13_ref.dtype), w13_ref[...],
                  preferred_element_type=jnp.float32)         # (S, 2*hidden)
    a1 = a13[:, :hidden]
    a3 = a13[:, hidden:]
    gated = a1 * jax.nn.sigmoid(a1) * a3                      # f32 SiLU * gate
    ff = jnp.dot(gated.astype(w2_ref.dtype), w2_ref[...],
                 preferred_element_type=jnp.float32)          # (S, D)

    out_ref[...] = (h_res + ff).astype(out_ref.dtype)


# ----------------------------------------------------------------------------
# Wrapper
# ----------------------------------------------------------------------------
def transformer_block(x, shared_q, cos_half, sin_half, params, *, n_heads, eps=1e-5):
    B, S, D = x.shape
    H = n_heads
    Dh = D // H
    hidden = params["w1"].shape[1]

    # Lane-dense activation layouts: (B*S, D)
    x2 = x.reshape(B * S, D)
    q2 = jnp.transpose(shared_q, (0, 2, 1, 3)).reshape(B * S, D)   # (B,H,S,Dh)->(B,S,H,Dh)

    # cos/sin per pair, repeated twice along head_dim and tiled across heads -> (S, D)
    cos_sd = jnp.tile(jnp.repeat(cos_half, 2, axis=-1), (1, H))
    sin_sd = jnp.tile(jnp.repeat(sin_half, 2, axis=-1), (1, H))

    # ---- Q rotary + 1/sqrt(Dh) pre-applied (reviewer-sanctioned wrapper precompute) ----
    qp = q2.reshape(B * S, D // 2, 2)
    q_swap = jnp.stack([-qp[..., 1], qp[..., 0]], axis=-1).reshape(B * S, D)
    cos_b = jnp.tile(cos_sd, (B, 1))                          # (B*S, D)
    sin_b = jnp.tile(sin_sd, (B, 1))
    q_rot = (q2 * cos_b + q_swap * sin_b) * (1.0 / math.sqrt(Dh))
    q_rot = q_rot.astype(jnp.bfloat16)                        # bf16 HBM I/O, bf16 MXU operand

    # ---- Signed pair-swap matrix folded into wk (weights only, no in-kernel matmul) ----
    #   (v @ P)[2i] = -v[2i+1], (v @ P)[2i+1] = v[2i]
    idx = jnp.arange(D // 2)
    P = jnp.zeros((D, D), jnp.float32)
    P = P.at[2 * idx + 1, 2 * idx].set(-1.0)
    P = P.at[2 * idx, 2 * idx + 1].set(1.0)
    wkP = params["wk"] @ P                                    # (D, D) f32

    # Fused bf16 weights for the MXU (accumulation stays f32 in-kernel)
    mx = jnp.bfloat16
    wkv = jnp.concatenate([params["wk"], wkP, params["wv"]], axis=1).astype(mx)  # (D, 3D)
    w13 = jnp.concatenate([params["w1"], params["w3"]], axis=1).astype(mx)       # (D, 2*hidden)
    wo = params["wo"].astype(mx)                                                 # (D, D)
    w2 = params["w2"].astype(mx)                                                 # (hidden, D)

    kernel = functools.partial(transformer_block_kernel,
                               H=H, Dh=Dh, hidden=hidden, eps=eps)

    tok_spec = pl.BlockSpec((S, D), lambda b: (b, 0))

    def full_spec(a):
        # full-array resident block (2-D), identical for every grid step
        return pl.BlockSpec(a.shape, lambda b: (0, 0))

    # Per-generation scoped-VMEM budget (~48 MiB on v7x, ~96 MiB on v5e/v6e)
    try:
        info = pltpu.get_tpu_info()
        vmem_cap = int(getattr(info, "vmem_capacity_bytes", 64 * 1024 * 1024))
    except Exception:
        vmem_cap = 64 * 1024 * 1024
    vmem_limit = min(int(0.75 * vmem_cap), 100 * 1024 * 1024)

    out2 = pl.pallas_call(
        kernel,
        out_shape=jax.ShapeDtypeStruct((B * S, D), jnp.float32),
        grid_spec=pltpu.PrefetchScalarGridSpec(
            num_scalar_prefetch=0,
            grid=(B,),
            in_specs=[
                tok_spec,                          # x (f32)
                tok_spec,                          # q_rot (bf16, rotary+scale applied)
                full_spec(cos_sd),                 # cos (S, D)
                full_spec(sin_sd),                 # sin (S, D)
                full_spec(params["attn_norm_w"]),  # (1, D)
                full_spec(params["ffn_norm_w"]),   # (1, D)
                full_spec(wkv),                    # (D, 3D)
                full_spec(wo),                     # (D, D)
                full_spec(w13),                    # (D, 2*hidden)
                full_spec(w2),                     # (hidden, D)
            ],
            out_specs=tok_spec,
        ),
        compiler_params=pltpu.CompilerParams(
            # batch tiles are independent -> megacore-shardable (v7x: 2 TCs/chip)
            dimension_semantics=("parallel",),
            vmem_limit_bytes=vmem_limit,
        ),
    )(x2, q_rot, cos_sd, sin_sd,
      params["attn_norm_w"], params["ffn_norm_w"],
      wkv, wo, w13, w2)
    return out2.reshape(B, S, D)


# ----------------------------------------------------------------------------
# Pure-JAX reference (mirrors the PyTorch forward exactly, full f32)
# ----------------------------------------------------------------------------
def reference_block(x, shared_q, cos_half, sin_half, params, *, n_heads, eps=1e-5):
    B, S, D = x.shape
    H = n_heads
    Dh = D // H

    def rms(v, w):
        return v * jax.lax.rsqrt(jnp.mean(v * v, axis=-1, keepdims=True) + eps) * w

    def rotate(v):  # v: (B, S, H, Dh), interleaved pairs, complex multiply
        vr = v.reshape(B, S, H, Dh // 2, 2)
        re = vr[..., 0] * cos_half[None, :, None, :] - vr[..., 1] * sin_half[None, :, None, :]
        im = vr[..., 0] * sin_half[None, :, None, :] + vr[..., 1] * cos_half[None, :, None, :]
        return jnp.stack([re, im], axis=-1).reshape(B, S, H, Dh)

    xn = rms(x, params["attn_norm_w"][0])
    xk = (xn @ params["wk"]).reshape(B, S, H, Dh)
    xv = (xn @ params["wv"]).reshape(B, S, H, Dh)
    xq = jnp.transpose(shared_q, (0, 2, 1, 3))               # (B, S, H, Dh)

    xq = rotate(xq)
    xk = rotate(xk)

    q = jnp.transpose(xq, (0, 2, 1, 3))                      # (B, H, S, Dh)
    k = jnp.transpose(xk, (0, 2, 1, 3))
    v = jnp.transpose(xv, (0, 2, 1, 3))

    scores = jnp.einsum("bhqd,bhkd->bhqk", q, k) / math.sqrt(Dh)
    scores = jax.nn.softmax(scores, axis=-1)
    out = jnp.einsum("bhqk,bhkd->bhqd", scores, v)
    out = jnp.transpose(out, (0, 2, 1, 3)).reshape(B, S, D)
    h = x + out @ params["wo"]

    hn = rms(h, params["ffn_norm_w"][0])
    ff = (jax.nn.silu(hn @ params["w1"]) * (hn @ params["w3"])) @ params["w2"]
    return h + ff


# ----------------------------------------------------------------------------
# Main
# ----------------------------------------------------------------------------
if __name__ == "__main__":
    # Small ModelArgs-consistent shapes
    B, S = 2, 8
    D, H = 32, 4
    Dh = D // H
    multiple_of = 32
    norm_eps = 1e-5

    # FeedForward hidden dim: int(2 * (4*D) / 3) rounded up to multiple_of
    hidden = int(2 * (4 * D) / 3)
    hidden = multiple_of * ((hidden + multiple_of - 1) // multiple_of)   # = 96

    key = jax.random.PRNGKey(0)
    keys = jax.random.split(key, 12)

    x = jax.random.normal(keys[0], (B, S, D), jnp.float32)
    shared_q = jax.random.normal(keys[1], (B, H, S, Dh), jnp.float32)

    params = {
        "wk": 0.1 * jax.random.normal(keys[2], (D, D), jnp.float32),
        "wv": 0.1 * jax.random.normal(keys[3], (D, D), jnp.float32),
        "wo": 0.1 * jax.random.normal(keys[4], (D, D), jnp.float32),
        "w1": 0.1 * jax.random.normal(keys[5], (D, hidden), jnp.float32),
        "w2": 0.1 * jax.random.normal(keys[6], (hidden, D), jnp.float32),
        "w3": 0.1 * jax.random.normal(keys[7], (D, hidden), jnp.float32),
        "attn_norm_w": (1.0 + 0.1 * jax.random.normal(keys[8], (1, D), jnp.float32)),
        "ffn_norm_w": (1.0 + 0.1 * jax.random.normal(keys[9], (1, D), jnp.float32)),
    }

    # freqs_cis (llama precompute), positions 0..S-1, head_dim Dh
    inv_freq = 1.0 / (10000.0 ** (jnp.arange(0, Dh, 2, dtype=jnp.float32) / Dh))  # (Dh/2,)
    t = jnp.arange(S, dtype=jnp.float32)
    angles = jnp.outer(t, inv_freq)                          # (S, Dh/2)
    cos_half = jnp.cos(angles)
    sin_half = jnp.sin(angles)

    out = transformer_block(x, shared_q, cos_half, sin_half, params,
                            n_heads=H, eps=norm_eps)
    out = jax.block_until_ready(out)

    ref = reference_block(x, shared_q, cos_half, sin_half, params,
                          n_heads=H, eps=norm_eps)
    assert out.shape == (B, S, D)
    max_err = float(jnp.max(jnp.abs(out - ref)))
    # bf16 MXU operands (projections + attention) with f32 accumulation -> ~1e-2 budget
    assert jnp.allclose(out, ref, rtol=2e-2, atol=2e-2), (
        "mismatch vs reference: max abs err = %g" % max_err)

    print("KERNEL_OK")
</pallas_src>

<mosaic_0001>
module attributes {stable_mosaic.version = 11 : i64} {
  func.func @transformer_block_kernel(%arg0: i32, %arg1: memref<8x32xf32, #tpu.memory_space<vmem>>, %arg2: memref<8x32xbf16, #tpu.memory_space<vmem>>, %arg3: memref<8x32xf32, #tpu.memory_space<vmem>>, %arg4: memref<8x32xf32, #tpu.memory_space<vmem>>, %arg5: memref<1x32xf32, #tpu.memory_space<vmem>>, %arg6: memref<1x32xf32, #tpu.memory_space<vmem>>, %arg7: memref<32x96xbf16, #tpu.memory_space<vmem>>, %arg8: memref<32x32xbf16, #tpu.memory_space<vmem>>, %arg9: memref<32x192xbf16, #tpu.memory_space<vmem>>, %arg10: memref<96x32xbf16, #tpu.memory_space<vmem>>, %arg11: memref<8x32xf32, #tpu.memory_space<vmem>>) attributes {dimension_semantics = [#tpu.dimension_semantics<parallel>], iteration_bounds = array<i64: 2>, scalar_prefetch = 0 : i64, scratch_operands = 0 : i64, tpu.core_type = #tpu.core_type<tc>, window_params = [{transform_indices = @transform_0, window_bounds = array<i64: 8, 32>}, {transform_indices = @transform_1, window_bounds = array<i64: 8, 32>}, {pipeline_mode = #tpu.pipeline_mode<synchronous>, transform_indices = @transform_2, window_bounds = array<i64: 8, 32>}, {pipeline_mode = #tpu.pipeline_mode<synchronous>, transform_indices = @transform_3, window_bounds = array<i64: 8, 32>}, {pipeline_mode = #tpu.pipeline_mode<synchronous>, transform_indices = @transform_4, window_bounds = array<i64: 1, 32>}, {pipeline_mode = #tpu.pipeline_mode<synchronous>, transform_indices = @transform_5, window_bounds = array<i64: 1, 32>}, {pipeline_mode = #tpu.pipeline_mode<synchronous>, transform_indices = @transform_6, window_bounds = array<i64: 32, 96>}, {pipeline_mode = #tpu.pipeline_mode<synchronous>, transform_indices = @transform_7, window_bounds = array<i64: 32, 32>}, {pipeline_mode = #tpu.pipeline_mode<synchronous>, transform_indices = @transform_8, window_bounds = array<i64: 32, 192>}, {pipeline_mode = #tpu.pipeline_mode<synchronous>, transform_indices = @transform_9, window_bounds = array<i64: 96, 32>}, {transform_indices = @transform_10, window_bounds = array<i64: 8, 32>}]} {
    %c0 = arith.constant 0 : index
    %c0_0 = arith.constant 0 : index
    %0 = vector.load %arg1[%c0, %c0_0] : memref<8x32xf32, #tpu.memory_space<vmem>>, vector<8x32xf32>
    %1 = arith.mulf %0, %0 : vector<8x32xf32>
    %cst = arith.constant dense<0.000000e+00> : vector<8xf32>
    %2 = vector.multi_reduction <add>, %1, %cst [1] : vector<8x32xf32> to vector<8xf32>
    %3 = vector.shape_cast %2 : vector<8xf32> to vector<8x1xf32>
    %cst_1 = arith.constant 3.200000e+01 : f32
    %4 = vector.broadcast %cst_1 : f32 to vector<8x1xf32>
    %5 = arith.divf %3, %4 : vector<8x1xf32>
    %cst_2 = arith.constant 9.99999974E-6 : f32
    %6 = vector.broadcast %cst_2 : f32 to vector<8x1xf32>
    %7 = arith.addf %5, %6 : vector<8x1xf32>
    %8 = math.rsqrt %7 : vector<8x1xf32>
    %9 = vector.broadcast %8 : vector<8x1xf32> to vector<8x32xf32>
    %10 = arith.mulf %0, %9 : vector<8x32xf32>
    %c0_3 = arith.constant 0 : index
    %c0_4 = arith.constant 0 : index
    %11 = vector.load %arg5[%c0_3, %c0_4] : memref<1x32xf32, #tpu.memory_space<vmem>>, vector<1x32xf32>
    %12 = vector.broadcast %11 : vector<1x32xf32> to vector<8x32xf32>
    %13 = arith.mulf %10, %12 : vector<8x32xf32>
    %14 = arith.truncf %13 : vector<8x32xf32> to vector<8x32xbf16>
    %c0_5 = arith.constant 0 : index
    %c0_6 = arith.constant 0 : index
    %15 = vector.load %arg7[%c0_5, %c0_6] : memref<32x96xbf16, #tpu.memory_space<vmem>>, vector<32x96xbf16>
    %cst_7 = arith.constant dense<0.000000e+00> : vector<8x96xf32>
    %16 = tpu.matmul %14, %15, %cst_7 {dimension_numbers = #tpu.dot_dimension_numbers<[1], [0], [0], [1], [0, 0, 1, 1], [], []>} : vector<8x32xbf16>, vector<32x96xbf16>, vector<8x96xf32> -> vector<8x96xf32>
    %c0_8 = arith.constant 0 : index
    %c0_9 = arith.constant 0 : index
    %17 = vector.load %arg3[%c0_8, %c0_9] : memref<8x32xf32, #tpu.memory_space<vmem>>, vector<8x32xf32>
    %c0_10 = arith.constant 0 : index
    %c0_11 = arith.constant 0 : index
    %18 = vector.load %arg4[%c0_10, %c0_11] : memref<8x32xf32, #tpu.memory_space<vmem>>, vector<8x32xf32>
    %19 = vector.extract_strided_slice %16 {offsets = [0, 0], sizes = [8, 32], strides = [1, 1]} : vector<8x96xf32> to vector<8x32xf32>
    %20 = arith.mulf %19, %17 : vector<8x32xf32>
    %21 = vector.extract_strided_slice %16 {offsets = [0, 32], sizes = [8, 32], strides = [1, 1]} : vector<8x96xf32> to vector<8x32xf32>
    %22 = arith.mulf %21, %18 : vector<8x32xf32>
    %23 = arith.addf %20, %22 : vector<8x32xf32>
    %24 = vector.extract_strided_slice %16 {offsets = [0, 64], sizes = [8, 32], strides = [1, 1]} : vector<8x96xf32> to vector<8x32xf32>
    %c0_12 = arith.constant 0 : index
    %c0_13 = arith.constant 0 : index
    %25 = vector.load %arg2[%c0_12, %c0_13] : memref<8x32xbf16, #tpu.memory_space<vmem>>, vector<8x32xbf16>
    %26 = arith.truncf %23 : vector<8x32xf32> to vector<8x32xbf16>
    %27 = arith.truncf %24 : vector<8x32xf32> to vector<8x32xbf16>
    %28 = vector.extract_strided_slice %25 {offsets = [0, 0], sizes = [8, 8], strides = [1, 1]} : vector<8x32xbf16> to vector<8x8xbf16>
    %29 = vector.extract_strided_slice %26 {offsets = [0, 0], sizes = [8, 8], strides = [1, 1]} : vector<8x32xbf16> to vector<8x8xbf16>
    %30 = vector.extract_strided_slice %27 {offsets = [0, 0], sizes = [8, 8], strides = [1, 1]} : vector<8x32xbf16> to vector<8x8xbf16>
    %cst_14 = arith.constant dense<0.000000e+00> : vector<8x8xf32>
    %31 = tpu.matmul %28, %29, %cst_14 {dimension_numbers = #tpu.dot_dimension_numbers<[1], [1], [0], [0], [0, 0, 1, 0], [], []>} : vector<8x8xbf16>, vector<8x8xbf16>, vector<8x8xf32> -> vector<8x8xf32>
    %cst_15 = arith.constant dense<0xFF800000> : vector<8xf32>
    %32 = vector.multi_reduction <maximumf>, %31, %cst_15 [1] : vector<8x8xf32> to vector<8xf32>
    %33 = vector.shape_cast %32 : vector<8xf32> to vector<8x1xf32>
    %34 = vector.broadcast %33 : vector<8x1xf32> to vector<8x8xf32>
    %35 = arith.subf %31, %34 : vector<8x8xf32>
    %36 = math.exp %35 : vector<8x8xf32>
    %cst_16 = arith.constant dense<0.000000e+00> : vector<8xf32>
    %37 = vector.multi_reduction <add>, %36, %cst_16 [1] : vector<8x8xf32> to vector<8xf32>
    %38 = vector.shape_cast %37 : vector<8xf32> to vector<8x1xf32>
    %39 = tpu.reciprocal %38 {approx = true} : vector<8x1xf32> -> vector<8x1xf32>
    %40 = vector.broadcast %39 : vector<8x1xf32> to vector<8x8xf32>
    %41 = arith.mulf %36, %40 : vector<8x8xf32>
    %42 = arith.truncf %41 : vector<8x8xf32> to vector<8x8xbf16>
    %cst_17 = arith.constant dense<0.000000e+00> : vector<8x8xf32>
    %43 = tpu.matmul %42, %30, %cst_17 {dimension_numbers = #tpu.dot_dimension_numbers<[1], [0], [0], [1], [0, 0, 1, 1], [], []>} : vector<8x8xbf16>, vector<8x8xbf16>, vector<8x8xf32> -> vector<8x8xf32>
    %44 = vector.extract_strided_slice %25 {offsets = [0, 8], sizes = [8, 8], strides = [1, 1]} : vector<8x32xbf16> to vector<8x8xbf16>
    %45 = vector.extract_strided_slice %26 {offsets = [0, 8], sizes = [8, 8], strides = [1, 1]} : vector<8x32xbf16> to vector<8x8xbf16>
    %46 = vector.extract_strided_slice %27 {offsets = [0, 8], sizes = [8, 8], strides = [1, 1]} : vector<8x32xbf16> to vector<8x8xbf16>
    %cst_18 = arith.constant dense<0.000000e+00> : vector<8x8xf32>
    %47 = tpu.matmul %44, %45, %cst_18 {dimension_numbers = #tpu.dot_dimension_numbers<[1], [1], [0], [0], [0, 0, 1, 0], [], []>} : vector<8x8xbf16>, vector<8x8xbf16>, vector<8x8xf32> -> vector<8x8xf32>
    %cst_19 = arith.constant dense<0xFF800000> : vector<8xf32>
    %48 = vector.multi_reduction <maximumf>, %47, %cst_19 [1] : vector<8x8xf32> to vector<8xf32>
    %49 = vector.shape_cast %48 : vector<8xf32> to vector<8x1xf32>
    %50 = vector.broadcast %49 : vector<8x1xf32> to vector<8x8xf32>
    %51 = arith.subf %47, %50 : vector<8x8xf32>
    %52 = math.exp %51 : vector<8x8xf32>
    %cst_20 = arith.constant dense<0.000000e+00> : vector<8xf32>
    %53 = vector.multi_reduction <add>, %52, %cst_20 [1] : vector<8x8xf32> to vector<8xf32>
    %54 = vector.shape_cast %53 : vector<8xf32> to vector<8x1xf32>
    %55 = tpu.reciprocal %54 {approx = true} : vector<8x1xf32> -> vector<8x1xf32>
    %56 = vector.broadcast %55 : vector<8x1xf32> to vector<8x8xf32>
    %57 = arith.mulf %52, %56 : vector<8x8xf32>
    %58 = arith.truncf %57 : vector<8x8xf32> to vector<8x8xbf16>
    %cst_21 = arith.constant dense<0.000000e+00> : vector<8x8xf32>
    %59 = tpu.matmul %58, %46, %cst_21 {dimension_numbers = #tpu.dot_dimension_numbers<[1], [0], [0], [1], [0, 0, 1, 1], [], []>} : vector<8x8xbf16>, vector<8x8xbf16>, vector<8x8xf32> -> vector<8x8xf32>
    %60 = vector.extract_strided_slice %25 {offsets = [0, 16], sizes = [8, 8], strides = [1, 1]} : vector<8x32xbf16> to vector<8x8xbf16>
    %61 = vector.extract_strided_slice %26 {offsets = [0, 16], sizes = [8, 8], strides = [1, 1]} : vector<8x32xbf16> to vector<8x8xbf16>
    %62 = vector.extract_strided_slice %27 {offsets = [0, 16], sizes = [8, 8], strides = [1, 1]} : vector<8x32xbf16> to vector<8x8xbf16>
    %cst_22 = arith.constant dense<0.000000e+00> : vector<8x8xf32>
    %63 = tpu.matmul %60, %61, %cst_22 {dimension_numbers = #tpu.dot_dimension_numbers<[1], [1], [0], [0], [0, 0, 1, 0], [], []>} : vector<8x8xbf16>, vector<8x8xbf16>, vector<8x8xf32> -> vector<8x8xf32>
    %cst_23 = arith.constant dense<0xFF800000> : vector<8xf32>
    %64 = vector.multi_reduction <maximumf>, %63, %cst_23 [1] : vector<8x8xf32> to vector<8xf32>
    %65 = vector.shape_cast %64 : vector<8xf32> to vector<8x1xf32>
    %66 = vector.broadcast %65 : vector<8x1xf32> to vector<8x8xf32>
    %67 = arith.subf %63, %66 : vector<8x8xf32>
    %68 = math.exp %67 : vector<8x8xf32>
    %cst_24 = arith.constant dense<0.000000e+00> : vector<8xf32>
    %69 = vector.multi_reduction <add>, %68, %cst_24 [1] : vector<8x8xf32> to vector<8xf32>
    %70 = vector.shape_cast %69 : vector<8xf32> to vector<8x1xf32>
    %71 = tpu.reciprocal %70 {approx = true} : vector<8x1xf32> -> vector<8x1xf32>
    %72 = vector.broadcast %71 : vector<8x1xf32> to vector<8x8xf32>
    %73 = arith.mulf %68, %72 : vector<8x8xf32>
    %74 = arith.truncf %73 : vector<8x8xf32> to vector<8x8xbf16>
    %cst_25 = arith.constant dense<0.000000e+00> : vector<8x8xf32>
    %75 = tpu.matmul %74, %62, %cst_25 {dimension_numbers = #tpu.dot_dimension_numbers<[1], [0], [0], [1], [0, 0, 1, 1], [], []>} : vector<8x8xbf16>, vector<8x8xbf16>, vector<8x8xf32> -> vector<8x8xf32>
    %76 = vector.extract_strided_slice %25 {offsets = [0, 24], sizes = [8, 8], strides = [1, 1]} : vector<8x32xbf16> to vector<8x8xbf16>
    %77 = vector.extract_strided_slice %26 {offsets = [0, 24], sizes = [8, 8], strides = [1, 1]} : vector<8x32xbf16> to vector<8x8xbf16>
    %78 = vector.extract_strided_slice %27 {offsets = [0, 24], sizes = [8, 8], strides = [1, 1]} : vector<8x32xbf16> to vector<8x8xbf16>
    %cst_26 = arith.constant dense<0.000000e+00> : vector<8x8xf32>
    %79 = tpu.matmul %76, %77, %cst_26 {dimension_numbers = #tpu.dot_dimension_numbers<[1], [1], [0], [0], [0, 0, 1, 0], [], []>} : vector<8x8xbf16>, vector<8x8xbf16>, vector<8x8xf32> -> vector<8x8xf32>
    %cst_27 = arith.constant dense<0xFF800000> : vector<8xf32>
    %80 = vector.multi_reduction <maximumf>, %79, %cst_27 [1] : vector<8x8xf32> to vector<8xf32>
    %81 = vector.shape_cast %80 : vector<8xf32> to vector<8x1xf32>
    %82 = vector.broadcast %81 : vector<8x1xf32> to vector<8x8xf32>
    %83 = arith.subf %79, %82 : vector<8x8xf32>
    %84 = math.exp %83 : vector<8x8xf32>
    %cst_28 = arith.constant dense<0.000000e+00> : vector<8xf32>
    %85 = vector.multi_reduction <add>, %84, %cst_28 [1] : vector<8x8xf32> to vector<8xf32>
    %86 = vector.shape_cast %85 : vector<8xf32> to vector<8x1xf32>
    %87 = tpu.reciprocal %86 {approx = true} : vector<8x1xf32> -> vector<8x1xf32>
    %88 = vector.broadcast %87 : vector<8x1xf32> to vector<8x8xf32>
    %89 = arith.mulf %84, %88 : vector<8x8xf32>
    %90 = arith.truncf %89 : vector<8x8xf32> to vector<8x8xbf16>
    %cst_29 = arith.constant dense<0.000000e+00> : vector<8x8xf32>
    %91 = tpu.matmul %90, %78, %cst_29 {dimension_numbers = #tpu.dot_dimension_numbers<[1], [0], [0], [1], [0, 0, 1, 1], [], []>} : vector<8x8xbf16>, vector<8x8xbf16>, vector<8x8xf32> -> vector<8x8xf32>
    %92 = tpu.concatenate %43, %59, %75, %91 in 1 : vector<8x8xf32>, vector<8x8xf32>, vector<8x8xf32>, vector<8x8xf32> -> vector<8x32xf32>
    %93 = arith.truncf %92 : vector<8x32xf32> to vector<8x32xbf16>
    %c0_30 = arith.constant 0 : index
    %c0_31 = arith.constant 0 : index
    %94 = vector.load %arg8[%c0_30, %c0_31] : memref<32x32xbf16, #tpu.memory_space<vmem>>, vector<32x32xbf16>
    %cst_32 = arith.constant dense<0.000000e+00> : vector<8x32xf32>
    %95 = tpu.matmul %93, %94, %cst_32 {dimension_numbers = #tpu.dot_dimension_numbers<[1], [0], [0], [1], [0, 0, 1, 1], [], []>} : vector<8x32xbf16>, vector<32x32xbf16>, vector<8x32xf32> -> vector<8x32xf32>
    %96 = arith.addf %0, %95 : vector<8x32xf32>
    %97 = arith.mulf %96, %96 : vector<8x32xf32>
    %cst_33 = arith.constant dense<0.000000e+00> : vector<8xf32>
    %98 = vector.multi_reduction <add>, %97, %cst_33 [1] : vector<8x32xf32> to vector<8xf32>
    %99 = vector.shape_cast %98 : vector<8xf32> to vector<8x1xf32>
    %cst_34 = arith.constant 3.200000e+01 : f32
    %100 = vector.broadcast %cst_34 : f32 to vector<8x1xf32>
    %101 = arith.divf %99, %100 : vector<8x1xf32>
    %cst_35 = arith.constant 9.99999974E-6 : f32
    %102 = vector.broadcast %cst_35 : f32 to vector<8x1xf32>
    %103 = arith.addf %101, %102 : vector<8x1xf32>
    %104 = math.rsqrt %103 : vector<8x1xf32>
    %105 = vector.broadcast %104 : vector<8x1xf32> to vector<8x32xf32>
    %106 = arith.mulf %96, %105 : vector<8x32xf32>
    %c0_36 = arith.constant 0 : index
    %c0_37 = arith.constant 0 : index
    %107 = vector.load %arg6[%c0_36, %c0_37] : memref<1x32xf32, #tpu.memory_space<vmem>>, vector<1x32xf32>
    %108 = vector.broadcast %107 : vector<1x32xf32> to vector<8x32xf32>
    %109 = arith.mulf %106, %108 : vector<8x32xf32>
    %110 = arith.truncf %109 : vector<8x32xf32> to vector<8x32xbf16>
    %c0_38 = arith.constant 0 : index
    %c0_39 = arith.constant 0 : index
    %111 = vector.load %arg9[%c0_38, %c0_39] : memref<32x192xbf16, #tpu.memory_space<vmem>>, vector<32x192xbf16>
    %cst_40 = arith.constant dense<0.000000e+00> : vector<8x192xf32>
    %112 = tpu.matmul %110, %111, %cst_40 {dimension_numbers = #tpu.dot_dimension_numbers<[1], [0], [0], [1], [0, 0, 1, 1], [], []>} : vector<8x32xbf16>, vector<32x192xbf16>, vector<8x192xf32> -> vector<8x192xf32>
    %113 = vector.extract_strided_slice %112 {offsets = [0, 0], sizes = [8, 96], strides = [1, 1]} : vector<8x192xf32> to vector<8x96xf32>
    %114 = vector.extract_strided_slice %112 {offsets = [0, 96], sizes = [8, 96], strides = [1, 1]} : vector<8x192xf32> to vector<8x96xf32>
    %115 = arith.negf %113 : vector<8x96xf32>
    %116 = math.exp %115 : vector<8x96xf32>
    %cst_41 = arith.constant 1.000000e+00 : f32
    %117 = vector.broadcast %cst_41 : f32 to vector<8x96xf32>
    %118 = arith.addf %117, %116 : vector<8x96xf32>
    %119 = arith.divf %117, %118 : vector<8x96xf32>
    %120 = arith.mulf %113, %119 : vector<8x96xf32>
    %121 = arith.mulf %120, %114 : vector<8x96xf32>
    %122 = arith.truncf %121 : vector<8x96xf32> to vector<8x96xbf16>
    %c0_42 = arith.constant 0 : index
    %c0_43 = arith.constant 0 : index
    %123 = vector.load %arg10[%c0_42, %c0_43] : memref<96x32xbf16, #tpu.memory_space<vmem>>, vector<96x32xbf16>
    %cst_44 = arith.constant dense<0.000000e+00> : vector<8x32xf32>
    %124 = tpu.matmul %122, %123, %cst_44 {dimension_numbers = #tpu.dot_dimension_numbers<[1], [0], [0], [1], [0, 0, 1, 1], [], []>} : vector<8x96xbf16>, vector<96x32xbf16>, vector<8x32xf32> -> vector<8x32xf32>
    %125 = arith.addf %96, %124 : vector<8x32xf32>
    %c0_45 = arith.constant 0 : index
    %c0_46 = arith.constant 0 : index
    %126 = vector.load %arg11[%c0_45, %c0_46] : memref<8x32xf32, #tpu.memory_space<vmem>>, vector<8x32xf32>
    tpu.vector_store %arg11[%c0_45, %c0_46], %125 {strides = array<i32>} : memref<8x32xf32, #tpu.memory_space<vmem>>, vector<8x32xf32>,
    return
  }
  func.func @transform_0(%arg0: i32) -> (i32, i32) {
    %c0_i32 = arith.constant 0 : i32
    %c0_i32_0 = arith.constant 0 : i32
    return %arg0, %c0_i32 : i32, i32
  }
  func.func @transform_1(%arg0: i32) -> (i32, i32) {
    %c0_i32 = arith.constant 0 : i32
    %c0_i32_0 = arith.constant 0 : i32
    return %arg0, %c0_i32 : i32, i32
  }
  func.func @transform_2(%arg0: i32) -> (i32, i32) {
    %c0_i32 = arith.constant 0 : i32
    %c0_i32_0 = arith.constant 0 : i32
    %c0_i32_1 = arith.constant 0 : i32
    return %c0_i32, %c0_i32_0 : i32, i32
  }
  func.func @transform_3(%arg0: i32) -> (i32, i32) {
    %c0_i32 = arith.constant 0 : i32
    %c0_i32_0 = arith.constant 0 : i32
    %c0_i32_1 = arith.constant 0 : i32
    return %c0_i32, %c0_i32_0 : i32, i32
  }
  func.func @transform_4(%arg0: i32) -> (i32, i32) {
    %c0_i32 = arith.constant 0 : i32
    %c0_i32_0 = arith.constant 0 : i32
    %c0_i32_1 = arith.constant 0 : i32
    return %c0_i32, %c0_i32_0 : i32, i32
  }
  func.func @transform_5(%arg0: i32) -> (i32, i32) {
    %c0_i32 = arith.constant 0 : i32
    %c0_i32_0 = arith.constant 0 : i32
    %c0_i32_1 = arith.constant 0 : i32
    return %c0_i32, %c0_i32_0 : i32, i32
  }
  func.func @transform_6(%arg0: i32) -> (i32, i32) {
    %c0_i32 = arith.constant 0 : i32
    %c0_i32_0 = arith.constant 0 : i32
    %c0_i32_1 = arith.constant 0 : i32
    return %c0_i32, %c0_i32_0 : i32, i32
  }
  func.func @transform_7(%arg0: i32) -> (i32, i32) {
    %c0_i32 = arith.constant 0 : i32
    %c0_i32_0 = arith.constant 0 : i32
    %c0_i32_1 = arith.constant 0 : i32
    return %c0_i32, %c0_i32_0 : i32, i32
  }
  func.func @transform_8(%arg0: i32) -> (i32, i32) {
    %c0_i32 = arith.constant 0 : i32
    %c0_i32_0 = arith.constant 0 : i32
    %c0_i32_1 = arith.constant 0 : i32
    return %c0_i32, %c0_i32_0 : i32, i32
  }
  func.func @transform_9(%arg0: i32) -> (i32, i32) {
    %c0_i32 = arith.constant 0 : i32
    %c0_i32_0 = arith.constant 0 : i32
    %c0_i32_1 = arith.constant 0 : i32
    return %c0_i32, %c0_i32_0 : i32, i32
  }
  func.func @transform_10(%arg0: i32) -> (i32, i32) {
    %c0_i32 = arith.constant 0 : i32
    %c0_i32_0 = arith.constant 0 : i32
    return %arg0, %c0_i32 : i32, i32
  }
}

</mosaic_0001>

<bundles_post_ra>
// kernel: tpu_custom_call.1
= control target key start
LH: loop header
LB: loop body
LE: loop exit
PB: predicated region body
PF: predicated region fallthrough
CT: control target
= control target key end

     0   :  { %s2231_s0 = inlined_call_operand.vmem [shape: f32[16,32], index: 0, kind: input, shape index: {}]   ;;  %s2232_s1 = inlined_call_operand.hbm [shape: bf16[16,32], index: 1, kind: input, shape index: {}]   ;;  %s2233_s2 = inlined_call_operand.hbm [shape: f32[8,32], index: 2, kind: input, shape index: {}]   ;;  %s2234_s3 = inlined_call_operand.vmem [shape: f32[8,32], index: 3, kind: input, shape index: {}]   ;;  %s2235_s4 = inlined_call_operand.vmem [shape: f32[1,32], index: 4, kind: input, shape index: {}]   ;;  %s2236_s5 = inlined_call_operand.vmem [shape: f32[1,32], index: 5, kind: input, shape index: {}]   ;;  %s2237_s6 = inlined_call_operand.vmem [shape: bf16[32,96], index: 6, kind: input, shape index: {}]   ;;  %s2238_s7 = inlined_call_operand.hbm [shape: bf16[32,32], index: 7, kind: input, shape index: {}]   ;;  %s2239_s8 = inlined_call_operand.vmem [shape: bf16[32,192], index: 8, kind: input, shape index: {}]   ;;  %s2240_s9 = inlined_call_operand.vmem [shape: bf16[96,32], index: 9, kind: input, shape index: {}]   ;;  %s2241_s10 = inlined_call_operand.hbm [shape: f32[16,32], index: 10, kind: output, shape index: {}]  }
   0x1   :  { %2245 = sst [smem:[#allocation12_spill]] %s2233_s2 }
   0x2   :  { %2246 = sst [smem:[#allocation13_spill]] %s2238_s7 }
   0x3   :  { %15 = vsyncpa [#allocation3], 0 }
   0x4   :  { %17 = vsyncpa [#allocation3 + $0x1], 0 }
   0x5   :  { %18 = vsyncpa [#allocation6], 0 }
   0x6   :  { %19 = vsyncpa [#allocation4], 0 }
   0x7   :  { %21 = vsyncpa [#allocation4 + $0x1], 0  ;;  %s1862_s13 = smov 0   ;;  %s1864_s14 = smov 0  }
   0x8   :  { %s1866_s15 = smov 0   ;;  %s1868_s16 = smov 0  }
   0x9 LB: > { %s1883_s17 = sadd.s32 4294967295, %s1784_s16   ;;  %s1347_s18 = sadd.s32 4294967294, %s1784_s16   ;;  %s1784_s16 = sphi %s1868_s16, %s2265_s16   ;;  %s1780_s15 = sphi %s1866_s15, %s2264_s15   ;;  %s1776_s14 = sphi %s1864_s14, %s2263_s14   ;;  %s1772_s13 = sphi %s1862_s13, %s2262_s13  }
   0xa   : > { %p73_p0 = scmp.ne.s32.totalorder %s1776_s14, %s1772_s13  ;;  %p2242_p1 = scmp.eq.s32.totalorder %s1883_s17, 0 }
   0xb   : > { %p271_p3 = scmp.eq.s32.totalorder %s1347_s18, 1  ;;  %p1348_p5 = scmp.ge.s32.totalorder %s1784_s16, 1 }
   0xc   : > { %p1892_p4 = por %p2242_p1, %p73_p0  ;;  %p278_p7 = scmp.lt.s32.totalorder %s1784_s16, 3 }
   0xd   : > { %p1897_p6 = por %p271_p3, %p73_p0  ;;  %s1786_s22 = smov [#allocation5]  }
   0xe   : > { %s2247_s19 = scalar_select %p1892_p4, 1, 0 }
   0xf   : > { %s2248_s20 = scalar_select %p1897_p6, 1, 0 }
  0x10   : > { %p1902_p8 = pnand %p1348_p5, %p278_p7  ;;  %s291_s23 = sshll.u32 %s1786_s22, 4  ;;  %s292_s23 = int_to_ptr.vmem [resolvable:$true] %s291_s23 }
  0x11   : > { %s1787_s24 = smov [#allocation7]   ;;  %s2251_s2 = sld [smem:[#allocation12_spill]] }
  0x12   : > { %s2249_s21 = scalar_select %p1902_p8, 1, 0 }
  0x13   : > { %p1515_p10 = pneg %p1902_p8  ;;  %s313_s25 = sshll.u32 %s1787_s24, 4  ;;  %s1915_s25 = int_to_ptr.vmem [resolvable:$true] %s313_s25 }
  0x15   : > { %p1911_p11 = pnand %p1515_p10, %p2242_p1 }
  0x17   : > { %s1628_s29 = scalar_lea.hbm %s2251_s2, 128  ;;  %p1630_p13 = pneg %p1911_p11 }
  0x18   : > { %p1629_p12 = scmp.ne.s32.totalorder %s2251_s2, %s1628_s29  ;;  %p1635_p5 = scmp.lt.u32.totalorder %s1628_s29, %s2251_s2 }
  0x1a   : > { %p1631_p0 = pnand %p1630_p13, %p1629_p12 }
  0x1c   : > { %p1632_p3 = pneg %p1631_p0 }
  0x1e   : > { %p1637_p7 = pnand %p1635_p5, %p1632_p3 }
  0x20   : > { %1640 = shalt.err (!%p1637_p7)
}
  0x21   : > { %s1641_s22 = scalar_lea.vmem %s292_s23, 128  ;;  %p1649_p2 = scmp.lt.s32.totalorder %s292_s23, %s292_s23 }
  0x22   : > { %p1642_p10 = scmp.ne.s32.totalorder %s292_s23, %s1641_s22  ;;  %p1650_p6 = scmp.lt.s32.totalorder %s1641_s22, %s1641_s22 }
  0x24   : > { %p1644_p9 = pnand %p1642_p10, %p1630_p13  ;;  %p1651_p4 = por %p1650_p6, %p1649_p2 }
  0x26   : > { %p1645_p1 = pneg %p1644_p9 }
  0x28   : > { %p1652_p8 = pnand %p1651_p4, %p1645_p1 }
  0x2a   : > { %1655 = shalt.err (!%p1652_p8)
}
  0x2b   : > { %1518 = dma.hbm_to_vmem [thread:$0]  (!%p1911_p11), %s2251_s2, 128, %s292_s23, [#allocation6]  }
  0x2c   : > { %s2252_s7 = sld [smem:[#allocation13_spill]] }
  0x32   : > { %s1656_s30 = scalar_lea.hbm %s2252_s7, 256 }
  0x33   : > { %p1657_p9 = scmp.ne.s32.totalorder %s2252_s7, %s1656_s30  ;;  %p1663_p4 = scmp.lt.u32.totalorder %s1656_s30, %s2252_s7 }
  0x35   : > { %p1659_p2 = pnand %p1657_p9, %p1630_p13 }
  0x37   : > { %p1660_p1 = pneg %p1659_p2 }
  0x39   : > { %p1665_p6 = pnand %p1663_p4, %p1660_p1 }
  0x3b   : > { %1668 = shalt.err (!%p1665_p6)
}
  0x3c   : > { %s1669_s23 = scalar_lea.vmem %s1915_s25, 256  ;;  %p1677_p3 = scmp.lt.s32.totalorder %s1915_s25, %s1915_s25 }
  0x3d   : > { %p1670_p8 = scmp.ne.s32.totalorder %s1915_s25, %s1669_s23  ;;  %p1678_p5 = scmp.lt.s32.totalorder %s1669_s23, %s1669_s23 }
  0x3f   : > { %p1672_p12 = pnand %p1670_p8, %p1630_p13  ;;  %p1679_p7 = por %p1678_p5, %p1677_p3 }
  0x41   : > { %p1673_p0 = pneg %p1672_p12 }
  0x43   : > { %p1680_p10 = pnand %p1679_p7, %p1673_p0 }
  0x45   : > { %1683 = shalt.err (!%p1680_p10)
}
  0x46   : > { %s1788_s24 = smov 64   ;;  %s1789_s27 = smov 4  }
  0x47   : > { %1521 = dma.hbm_to_vmem [thread:$0]  (!%p1911_p11), %s2252_s7, 256, %s1915_s25, [#allocation6], %s1788_s24, %s1788_s24, %s1789_s27  }
  0x48   : > { %s1965_s30 = sadd.s32 1, %s1784_s16   ;;  %s60_s11 = sadd.s32 1, %s1780_s15 }
  0x49   : > { %s57_s12 = ssub.s32 %s1784_s16, %s1965_s30  ;;  %p67_p13 = scmp.ne.s32.totalorder %s1780_s15, %s1776_s14 }
  0x4a   : > { %p58_p9 = scmp.eq.s32.totalorder %s57_s12, 0  ;;  %p68_p2 = scmp.eq.s32.totalorder %s1784_s16, 0 }
  0x4b   : > { %p2253_p1 = scmp.eq.s32.totalorder %s1883_s17, 1  ;;  %p1532_p6 = scmp.lt.s32.totalorder %s1784_s16, 2 }
  0x4c   : > { %s1981_s22 = scalar_select %p58_p9, %s1780_s15, %s60_s11  }
  0x4d   : > { %p1975_p4 = por %p2253_p1, %p67_p13  ;;  %p69_p8 = por %p68_p2, %p67_p13 }
  0x4e   : > { %s340_s26 = sand.u32 1, %s1780_s15   ;;  %s1353_s25 = sshll.u32 %s1784_s16, 6 }
  0x4f   : > { %s1352_s23 = sshll.u32 %s340_s26, 2  ;;  %s1988_s28 = scalar_lea.hbm %s2232_s1, %s1353_s25 }
  0x50   : > { %s344_s29 = scalar_lea.vmem [#allocation2], %s1352_s23  ;;  %p1992_p11 = pnand %p1532_p6, %p69_p8 }
  0x51   : > { %s351_s12 = sshll.u32 %s344_s29, 4  ;;  %s341_s2 = scalar_lea.sflag [#allocation3], %s340_s26  ;;  %s1990_s12 = int_to_ptr.vmem [resolvable:$true] %s351_s12 }
  0x52   : > { %s1684_s7 = scalar_lea.hbm %s1988_s28, 64  ;;  %p1686_p0 = pneg %p1992_p11 }
  0x53   : > { %p1685_p12 = scmp.ne.s32.totalorder %s1988_s28, %s1684_s7  ;;  %s1689_s24 = scalar_lea.hbm %s2232_s1, 128 }
  0x54   : > { %p1690_p7 = scmp.lt.u32.totalorder %s1988_s28, %s2232_s1  ;;  %p1691_p10 = scmp.lt.u32.totalorder %s1689_s24, %s1684_s7 }
  0x55   : > { %p1687_p3 = pnand %p1686_p0, %p1685_p12  ;;  %p1693_p9 = scmp.lt.u32.totalorder %s1684_s7, %s1988_s28 }
  0x56   : > { %p1692_p13 = por %p1691_p10, %p1690_p7 }
  0x57   : > { %p1688_p5 = pneg %p1687_p3 }
  0x58   : > { %p1694_p2 = por %p1693_p9, %p1692_p13 }
  0x5a   : > { %p1695_p1 = pnand %p1694_p2, %p1688_p5 }
  0x5c   : > { %1698 = shalt.err (!%p1695_p1)
}
  0x5d   : > { %s1699_s26 = scalar_lea.vmem %s1990_s12, 64  ;;  %s1790_s25 = smov [#allocation2]  }
  0x5e   : > { %p1700_p6 = scmp.ne.s32.totalorder %s1990_s12, %s1699_s26  ;;  %s1704_s23 = sshll.u32 %s1790_s25, 4  ;;  %s1705_s23 = int_to_ptr.vmem [resolvable:$false] %s1704_s23 }
  0x5f   : > { %s1706_s27 = scalar_lea.vmem %s1705_s23, 128  ;;  %p1707_p3 = scmp.lt.s32.totalorder %s1990_s12, %s1705_s23 }
  0x60   : > { %p1702_p8 = pnand %p1700_p6, %p1686_p0  ;;  %p1708_p7 = scmp.lt.s32.totalorder %s1706_s27, %s1699_s26 }
  0x62   : > { %p1703_p12 = pneg %p1702_p8  ;;  %p1709_p10 = por %p1708_p7, %p1707_p3 }
  0x64   : > { %p1710_p13 = pnand %p1709_p10, %p1703_p12 }
  0x66   : > { %1713 = shalt.err (!%p1710_p13)
}
  0x67   : > { %1525 = dma.hbm_to_vmem [thread:$0]  (!%p1992_p11), %s1988_s28, 64, %s1990_s12, %s341_s2  }
  0x68   : > { %p2256_p5 = scmp.ne.s32.totalorder %s2249_s21, 0 }
  0x69   : > { %s2024_s7 = sand.u32 (!%p2256_p5), 1, %s1776_s14   ;;  %p2257_p0 = scmp.ne.s32.totalorder (!%p2256_p5), %s2247_s19, 0 }
  0x6a   : > { %360 = sbr.rel (%p2256_p5) target bundleno = 2573 (0xa0d), region = 60  ;;  %s1355_s24 = sshll.u32 (!%p2256_p5), %s2024_s7, 2 }
  0x6b   : > { %s363_s29 = scalar_lea.sflag (!%p2256_p5), [#allocation3], %s2024_s7  ;;  %s2028_s26 = scalar_lea.vmem (!%p2256_p5), [#allocation2], %s1355_s24 }
  0x71   : > { %1759 = dma.done.wait (%p2257_p0), %s363_s29, 64  }
  0x72   : > { %1761 = vsyncadd (%p2257_p0), %s363_s29, 4294967232  ;;  %p2258_p11 = scmp.eq.s32.totalorder %s1883_s17, 0 }
  0x74   : > { %1763 = dma.done.wait (%p2258_p11), [#allocation6], 384   ;;  %p2259_p9 = pmov %p2258_p11 }
  0x75   : > { %p415_p2 = scmp.lt.s32.totalorder %s1883_s17, 1  ;;  %vm422_vm0 = vcmask 261120   ;;  %v1587_v3 = vld [vmem:[%s2237_s6] sm:$0xff]   ;;  %v1791_v4 = vmov 0.0   ;;  %vm1792_vm1 = vmmov 0   ;;  %v1588_v5 = vld [vmem:[%s2237_s6 + $0x8] sm:$0xff]  }
  0x76   : > { %1765 = vsyncadd (%p2259_p9), [#allocation6], 4294966912  ;;  %1423 = vmatprep.subr.bf16.mxu0 %v1791_v4  ;;  %1427 = vmatprep.mubr.msk.bf16.mxu0 %vm1792_vm1, %v1791_v4  ;;  %v500_v6 = vld [vmem:[%s2234_s3] sm:$0xff]  ;;  %s1794_s12 = smov 96   ;;  %v499_v21 = vld [vmem:[#allocation5] sm:$0xff]  ;;  %vm515_vm2 = vcmask 64512  }
  0x77   : > { %s416_s2 = scalar_select %p415_p2, %s1883_s17, 1  ;;  %1424 = vmatpush3.bf16.msra.mxu0 %v1587_v3  ;;  %1443 = vmatprep.subr.bf16.mxu1 %v1791_v4  ;;  %v1360_v11 = vld [vmem:[%s2235_s4] ss:$0 sm:$0xff]  ;;  %vm580_vm3 = vcmask 1043456   ;;  %vm971_vm4 = vcmask 130048   ;;  %vm973_vm5 = vcmask 195584  }
  0x78   : > { %1425 = vmatprep.subr.bf16.mxu0 %v1791_v4  ;;  %1445 = vmatprep.mubr.msk.bf16.mxu1 %vm1792_vm1, %v1791_v4  ;;  %v512_v25 = vld [vmem:[%s2028_s26] sm:$0xf]  ;;  %s1796_s19 = smov 112   ;;  %s1797_s25 = smov 104   ;;  %vm1186_vm6 = vcmask 785408  }
  0x79   : > { %s1359_s21 = sshll.u32 %s416_s2, 3  ;;  %s1793_s2 = smov 32   ;;  %v1366_v28 = vcombine.low %v512_v25, %v512_v25 }
  0x7a   : > { %s418_s11 = scalar_lea.vmem %s2231_s0, %s1359_s21  ;;  %s1798_s26 = smov 64  }
  0x7b   : > { %v2043_v0 = vld [vmem:[%s418_s11] sm:$0xff]  ;;  %1426 = vmatpush3.bf16.msra.mxu0 %v1588_v5  ;;  %s1795_s11 = smov 120   ;;  %s1799_s23 = smov 48  }
  0x7c   : > { %v421_v1 = vmul.f32 %v2043_v0, %v2043_v0  ;;  %1431 = vmatprep.subr.bf16.mxu0 %v1791_v4  ;;  %s1800_s27 = smov 40   ;;  %s1801_s24 = smov 56  }
  0x7d   : > { %s1802_s29 = smov 8   ;;  %s1803_s21 = smov 16  }
  0x7e   : > { %v423_v2 = vsel %vm422_vm0, %v421_v1, 0.0  ;;  %s1804_s28 = smov 24  }
  0x7f   : > { %424 = vadd.xlane.f32.xlu0 %v423_v2 }
  0x95   : > { %503 = vrot.lane.b32.xlu0 %v500_v6, %s1793_s2 }
 0x10c   : > { %v425_v7 = vpop.xlane.xlu0 %424 }
 0x10d   : > { %v427_v8 = vmul.f32 0.03125, %v425_v7 }
 0x10f   : > { %v428_v9 = vadd.f32 1e-05, %v427_v8 }
 0x110   : > { %v504_v15 = vpop.permute.xlu0 %503 }
 0x111   : > { %1604 = vrsqrt.f32 %v428_v9 }
 0x11b   : > { %v1605_v10 = vpop.eup %1604 }
 0x11c   : > { %v430_v12 = vmul.f32 %v1605_v10, %v2043_v0 }
 0x11e   : > { %v438_v13 = vmul.f32 %v1360_v11, %v430_v12 }
 0x120   : > { %v439_v14 = vpack.c.bf16 %v438_v13, %v438_v13 }
 0x122   : > { %1428 = vmatmul.mubr.msk.bf16.vlgmr.msra.gmra.mrb[0].mxu0 %vm422_vm0, %v439_v14 }
 0x123   : > { %1433 = vmatprep.mubr.msk.bf16.mxu0 %vm1792_vm1, %v1791_v4 }
 0x1f5   : > { %v2073_v16 = vpop.f32.mrb[0].mxu0 }
 0x1f6   : > { %v506_v17 = vmul.f32 %v504_v15, %v2073_v16  ;;  %v1429_v18 = vpop.f32.mrb[1].mxu0  ;;  %v501_v22 = vmul.f32 %v499_v21, %v2073_v16  ;;  %v514_v63 = vpack.c.bf16 %v2073_v16, %v2073_v16 }
 0x1f7   : > { %v496_v19 = vpop.f32.mrb[2].mxu0 }
 0x1f8   : > { %v1430_v20 = vpop.f32.mrb[3].mxu0  ;;  %508 = vrot.lane.b32.xlu1 %v506_v17, %s1794_s12  ;;  %s1358_s12 = sshll.u32 %s2024_s7, 3 }
 0x26a   : > { %v509_v23 = vpop.permute.xlu1 %508 }
 0x26b   : > { %v511_v24 = vadd.f32 %v509_v23, %v501_v22 }
 0x26d   : > { %v513_v26 = vpack.c.bf16 %v511_v24, %v511_v24 }
 0x26f   : > { %630 = vrot.lane.b32.xlu1 %v513_v26, %s1795_s11  ;;  %v520_v27 = vsel %vm515_vm2, %v513_v26, 0 }
 0x270   : > { %1432 = vmatpush3.bf16.xpose.msra.mxu0 %v520_v27 }
 0x271   : > { %1437 = vmatprep.subr.bf16.mxu0 %v1791_v4 }
 0x273   : > { %627 = vrot.lane.b32.xlu1 %v1366_v28, %s1795_s11  ;;  %s414_s11 = scalar_lea.vmem [#allocation8], %s1358_s12 }
 0x277   : > { %740 = vrot.lane.b32.xlu1 %v513_v26, %s1796_s19  ;;  %1434 = vmatmul.mubr.msk.bf16.vlgmr.msra.gmra.mrb[4].mxu0 %vm515_vm2, %v512_v25 }
 0x278   : > { %1439 = vmatprep.mubr.msk.bf16.mxu0 %vm1792_vm1, %v1791_v4 }
 0x27b   : > { %738 = vrot.lane.b32.xlu1 %v1366_v28, %s1796_s19  ;;  %s1246_s19 = sshll.u32 %s414_s11, 4  ;;  %s2188_s19 = int_to_ptr.vmem [resolvable:$true] %s1246_s19 }
 0x27f   : > { %850 = vrot.lane.b32.xlu1 %v513_v26, %s1797_s25 }
 0x283   : > { %848 = vrot.lane.b32.xlu1 %v1366_v28, %s1797_s25 }
 0x2e1   : > { %v631_v29 = vpop.permute.xlu1 %630 }
 0x2e2   : > { %v636_v30 = vsel %vm515_vm2, %v631_v29, 0 }
 0x2e3   : > { %1444 = vmatpush3.bf16.xpose.msra.mxu1 %v636_v30 }
 0x2e4   : > { %1455 = vmatprep.subr.bf16.mxu1 %v1791_v4 }
 0x2e5   : > { %v628_v31 = vpop.permute.xlu1 %627 }
 0x2e9   : > { %v741_v32 = vpop.permute.xlu1 %740 }
 0x2ea   : > { %v746_v33 = vsel %vm515_vm2, %v741_v32, 0  ;;  %1446 = vmatmul.mubr.msk.bf16.vlgmr.msra.gmra.mrb[0].mxu1 %vm515_vm2, %v628_v31 }
 0x2eb   : > { %1456 = vmatpush3.bf16.xpose.msra.mxu1 %v746_v33  ;;  %1457 = vmatprep.mubr.msk.bf16.mxu1 %vm1792_vm1, %v1791_v4 }
 0x2ec   : > { %1467 = vmatprep.subr.bf16.mxu1 %v1791_v4 }
 0x2ed   : > { %v739_v34 = vpop.permute.xlu1 %738 }
 0x2f1   : > { %v851_v35 = vpop.permute.xlu1 %850 }
 0x2f2   : > { %v856_v36 = vsel %vm515_vm2, %v851_v35, 0  ;;  %1458 = vmatmul.mubr.msk.bf16.vlgmr.msra.gmra.mrb[4].mxu1 %vm515_vm2, %v739_v34 }
 0x2f3   : > { %1468 = vmatpush3.bf16.xpose.msra.mxu1 %v856_v36  ;;  %1469 = vmatprep.mubr.msk.bf16.mxu1 %vm1792_vm1, %v1791_v4 }
 0x2f4   : > { %1479 = vmatprep.subr.bf16.mxu1 %v1791_v4 }
 0x2f5   : > { %v849_v37 = vpop.permute.xlu1 %848 }
 0x2fa   : > { %1470 = vmatmul.mubr.msk.bf16.vlgmr.msra.gmra.mrb[8].mxu1 %vm515_vm2, %v849_v37 }
 0x2fb   : > { %1483 = vmatprep.mubr.msk.bf16.mxu1 %vm1792_vm1, %v1791_v4 }
 0x34a   : > { %v556_v38 = vpop.f32.mrb[4].mxu0 }
 0x34b   : > { %v562_v39 = vsel %vm515_vm2, %v556_v38, -inf  ;;  %v1435_v40 = vpop.f32.mrb[5].mxu0 }
 0x34c   : > { %563 = vmax.xlane.f32.xlu0 %v562_v39  ;;  %v559_v41 = vpop.f32.mrb[6].mxu0 }
 0x34d   : > { %v1436_v42 = vpop.f32.mrb[7].mxu0 }
 0x3bd   : > { %v672_v43 = vpop.f32.mrb[0].mxu1 }
 0x3be   : > { %v1447_v44 = vpop.f32.mrb[1].mxu1  ;;  %v678_v45 = vsel %vm515_vm2, %v672_v43, -inf }
 0x3bf   : > { %679 = vmax.xlane.f32.xlu1 %v678_v45  ;;  %v675_v46 = vpop.f32.mrb[2].mxu1  ;;  %v1590_v45 = vld [vmem:[#allocation7] sm:$0xff]  }
 0x3c0   : > { %v1448_v47 = vpop.f32.mrb[3].mxu1  ;;  %1480 = vmatpush3.bf16.msra.mxu1 %v1590_v45 }
 0x3c1   : > { %1481 = vmatprep.subr.bf16.mxu1 %v1791_v4 }
 0x3c5   : > { %v782_v48 = vpop.f32.mrb[4].mxu1 }
 0x3c6   : > { %v1459_v49 = vpop.f32.mrb[5].mxu1  ;;  %v788_v50 = vsel %vm515_vm2, %v782_v48, -inf }
 0x3c7   : > { %v785_v51 = vpop.f32.mrb[6].mxu1  ;;  %789 = vmax.xlane.f32.xlu0 %v788_v50  ;;  %v1591_v50 = vld [vmem:[#allocation7 + $0x8] sm:$0xff]  }
 0x3c8   : > { %v1460_v52 = vpop.f32.mrb[7].mxu1  ;;  %1482 = vmatpush3.bf16.msra.mxu1 %v1591_v50 }
 0x3c9   : > { %1487 = vmatprep.subr.bf16.mxu1 %v1791_v4 }
 0x3cd   : > { %v892_v53 = vpop.f32.mrb[8].mxu1 }
 0x3ce   : > { %v1471_v54 = vpop.f32.mrb[9].mxu1  ;;  %v898_v55 = vsel %vm515_vm2, %v892_v53, -inf }
 0x3cf   : > { %v895_v56 = vpop.f32.mrb[10].mxu1  ;;  %899 = vmax.xlane.f32.xlu0 %v898_v55 }
 0x3d0   : > { %v1472_v57 = vpop.f32.mrb[11].mxu1 }
 0x3d9   : > { %v564_v58 = vpop.xlane.xlu0 %563 }
 0x3da   : > { %v565_v59 = vsub.f32 %v556_v38, %v564_v58 }
 0x3dc   : > { %v566_v60 = vmul.f32 1.442695, %v565_v59 }
 0x3de   : > { %1606 = vpow2.f32 %v566_v60 }
 0x3e8   : > { %v1607_v61 = vpop.eup %1606 }
 0x3e9   : > { %v568_v62 = vsel %vm515_vm2, %v1607_v61, 0.0 }
 0x3ea   : > { %569 = vadd.xlane.f32.xlu1 %v568_v62 }
 0x3fb   : > { %575 = vrot.lane.b32.xlu1 %v514_v63, %s1798_s26 }
 0x44c   : > { %v680_v1 = vpop.xlane.xlu1 %679 }
 0x44d   : > { %v681_v2 = vsub.f32 %v672_v43, %v680_v1 }
 0x44f   : > { %v682_v3 = vmul.f32 1.442695, %v681_v2 }
 0x451   : > { %1608 = vpow2.f32 %v682_v3 }
 0x454   : > { %v790_v5 = vpop.xlane.xlu0 %789 }
 0x455   : > { %v791_v6 = vsub.f32 %v782_v48, %v790_v5 }
 0x457   : > { %v792_v7 = vmul.f32 1.442695, %v791_v6 }
 0x459   : > { %1610 = vpow2.f32 %v792_v7 }
 0x45b   : > { %v1609_v8 = vpop.eup %1608 }
 0x45c   : > { %v900_v9 = vpop.xlane.xlu0 %899  ;;  %v684_v10 = vsel %vm515_vm2, %v1609_v8, 0.0 }
 0x45d   : > { %v901_v11 = vsub.f32 %v892_v53, %v900_v9  ;;  %685 = vadd.xlane.f32.xlu0 %v684_v10 }
 0x45f   : > { %v902_v12 = vmul.f32 1.442695, %v901_v11  ;;  %v1594_v11 = vld [vmem:[%s2239_s8 + $0x4] ss:$8 sps:$4 sm:$0xff]  }
 0x461   : > { %1612 = vpow2.f32 %v902_v12  ;;  %v1592_v12 = vld [vmem:[%s2239_s8] ss:$8 sps:$4 sm:$0xff]  }
 0x463   : > { %v1611_v13 = vpop.eup %1610 }
 0x464   : > { %v794_v14 = vsel %vm515_vm2, %v1611_v13, 0.0 }
 0x465   : > { %795 = vadd.xlane.f32.xlu1 %v794_v14  ;;  %v1805_v14 = vmov 0  }
 0x46b   : > { %v1613_v15 = vpop.eup %1612 }
 0x46c   : > { %v904_v16 = vsel %vm515_vm2, %v1613_v15, 0.0 }
 0x46d   : > { %905 = vadd.xlane.f32.xlu0 %v904_v16 }
 0x476   : > { %800 = vrot.lane.b32.xlu1 %v514_v63, %s1799_s23 }
 0x477   : > { %v570_v17 = vpop.xlane.xlu1 %569 }
 0x478   : > { %1614 = vrcp.f32 %v570_v17 }
 0x47a   : > { %910 = vrot.lane.b32.xlu1 %v514_v63, %s1800_s27  ;;  %s1714_s27 = scalar_lea.vmem %s2188_s19, 128 }
 0x47b   : > { %v576_v18 = vpop.permute.xlu1 %575  ;;  %p1715_p1 = scmp.ne.s32.totalorder %s2188_s19, %s1714_s27 }
 0x47c   : > { %v582_v19 = vsel %vm580_vm3, %v576_v18, 0 }
 0x47d   : > { %1438 = vmatpush3.bf16.msra.mxu0 %v582_v19  ;;  %v1376_v19 = vld [vmem:[%s2236_s5] ss:$0 sm:$0xff]  ;;  %p1716_p6 = pnand %p1715_p1, %p1975_p4 }
 0x47e   : > { %1449 = vmatprep.subr.bf16.mxu0 %v1791_v4 }
 0x47f   : > { %p1717_p8 = pneg %p1716_p6 }
 0x482   : > { %v1615_v20 = vpop.eup %1614 }
 0x483   : > { %v572_v21 = vmul.f32 %v1615_v20, %v1607_v61  ;;  %690 = vrot.lane.b32.xlu0 %v514_v63, %s1801_s24  ;;  %s1806_s24 = smov [#allocation8]  }
 0x485   : > { %v573_v22 = vpack.c.bf16 %v572_v21, %v572_v21 }
 0x487   : > { %1440 = vmatmul.mubr.msk.bf16.vlgmr.msra.gmra.mrb[8].mxu0 %vm515_vm2, %v573_v22 }
 0x488   : > { %1451 = vmatprep.mubr.msk.bf16.mxu0 %vm1792_vm1, %v1791_v4 }
 0x4ea   : > { %v686_v23 = vpop.xlane.xlu0 %685 }
 0x4eb   : > { %1616 = vrcp.f32 %v686_v23  ;;  %v1598_v23 = vld [vmem:[%s2240_s9] sm:$0xff]  }
 0x4f2   : > { %v796_v24 = vpop.xlane.xlu1 %795 }
 0x4f3   : > { %1618 = vrcp.f32 %v796_v24  ;;  %v1599_v24 = vld [vmem:[%s2240_s9 + $0x8] sm:$0xff]  }
 0x4f5   : > { %v1617_v25 = vpop.eup %1616 }
 0x4f6   : > { %v688_v27 = vmul.f32 %v1617_v25, %v1609_v8  ;;  %v801_v30 = vpop.permute.xlu1 %800  ;;  %v1600_v25 = vld [vmem:[%s2240_s9 + $0x10] sm:$0xff]  }
 0x4f7   : > { %v806_v33 = vsel %vm580_vm3, %v801_v30, 0 }
 0x4f8   : > { %v689_v31 = vpack.c.bf16 %v688_v27, %v688_v27  ;;  %v1602_v27 = vld [vmem:[%s2240_s9 + $0x20] sm:$0xff]  }
 0x4fa   : > { %v906_v26 = vpop.xlane.xlu0 %905  ;;  %v911_v35 = vpop.permute.xlu1 %910 }
 0x4fb   : > { %1620 = vrcp.f32 %v906_v26  ;;  %v916_v38 = vsel %vm580_vm3, %v911_v35, 0  ;;  %v1601_v26 = vld [vmem:[%s2240_s9 + $0x18] sm:$0xff]  }
 0x4fd   : > { %v1619_v32 = vpop.eup %1618 }
 0x4fe   : > { %v691_v28 = vpop.permute.xlu0 %690  ;;  %v798_v34 = vmul.f32 %v1619_v32, %v1611_v13  ;;  %v1597_v13 = vld [vmem:[%s2239_s8 + $0x14] ss:$8 sps:$4 sm:$0xff]  }
 0x4ff   : > { %v696_v29 = vsel %vm580_vm3, %v691_v28, 0  ;;  %v1603_v28 = vld [vmem:[%s2240_s9 + $0x28] sm:$0xff]  }
 0x500   : > { %1450 = vmatpush3.bf16.msra.mxu0 %v696_v29  ;;  %v799_v36 = vpack.c.bf16 %v798_v34, %v798_v34 }
 0x501   : > { %1461 = vmatprep.subr.bf16.mxu0 %v1791_v4 }
 0x503   : > { %1452 = vmatmul.mubr.msk.bf16.vlgmr.msra.gmra.mrb[12].mxu0 %vm515_vm2, %v689_v31 }
 0x504   : > { %1462 = vmatpush3.bf16.msra.mxu0 %v806_v33  ;;  %1463 = vmatprep.mubr.msk.bf16.mxu0 %vm1792_vm1, %v1791_v4 }
 0x505   : > { %1473 = vmatprep.subr.bf16.mxu0 %v1791_v4  ;;  %v1621_v37 = vpop.eup %1620 }
 0x506   : > { %v908_v39 = vmul.f32 %v1621_v37, %v1613_v15 }
 0x508   : > { %v909_v40 = vpack.c.bf16 %v908_v39, %v908_v39 }
 0x50b   : > { %1464 = vmatmul.mubr.msk.bf16.vlgmr.msra.gmra.mrb[16].mxu0 %vm515_vm2, %v799_v36 }
 0x50c   : > { %1474 = vmatpush3.bf16.msra.mxu0 %v916_v38  ;;  %1475 = vmatprep.mubr.msk.bf16.mxu0 %vm1792_vm1, %v1791_v4 }
 0x50d   : > { %1080 = vmatprep.subr.bf16.mxu0 %v1594_v11 }
 0x513   : > { %1476 = vmatmul.mubr.msk.bf16.vlgmr.msra.gmra.mrb[20].mxu0 %vm515_vm2, %v909_v40 }
 0x514   : > { %1081 = vmatpush1.bf16.msra.mxu0 %v1592_v12  ;;  %1112 = vmatprep.mubr.bf16.mxu0 %v1805_v14 }
 0x515   : > { %1082 = vmatprep.subr.bf16.mxu0 %v1597_v13 }
 0x55a   : > { %v618_v41 = vpop.f32.mrb[8].mxu0 }
 0x55b   : > { %v1441_v42 = vpop.f32.mrb[9].mxu0 }
 0x55c   : > { %v621_v43 = vpop.f32.mrb[10].mxu0 }
 0x55d   : > { %v1442_v44 = vpop.f32.mrb[11].mxu0 }
 0x5d6   : > { %v732_v46 = vpop.f32.mrb[12].mxu0 }
 0x5d7   : > { %959 = vrot.lane.b32.xlu0 %v732_v46, %s1802_s29  ;;  %v1453_v47 = vpop.f32.mrb[13].mxu0  ;;  %s1718_s29 = sshll.u32 %s1806_s24, 4  ;;  %s1719_s29 = int_to_ptr.vmem [resolvable:$false] %s1718_s29 }
 0x5d8   : > { %v735_v48 = vpop.f32.mrb[14].mxu0  ;;  %p1721_p12 = scmp.lt.s32.totalorder %s2188_s19, %s1719_s29 }
 0x5d9   : > { %v1454_v49 = vpop.f32.mrb[15].mxu0 }
 0x5de   : > { %v842_v51 = vpop.f32.mrb[16].mxu0 }
 0x5df   : > { %963 = vrot.lane.b32.xlu1 %v842_v51, %s1803_s21  ;;  %v1465_v52 = vpop.f32.mrb[17].mxu0  ;;  %s1720_s21 = scalar_lea.vmem %s1719_s29, 256 }
 0x5e0   : > { %v845_v53 = vpop.f32.mrb[18].mxu0  ;;  %p1722_p3 = scmp.lt.s32.totalorder %s1720_s21, %s1714_s27 }
 0x5e1   : > { %v1466_v54 = vpop.f32.mrb[19].mxu0 }
 0x5e2   : > { %p1723_p7 = por %p1722_p3, %p1721_p12 }
 0x5e4   : > { %p1724_p10 = pnand %p1723_p7, %p1717_p8 }
 0x5e6   : > { %v952_v55 = vpop.f32.mrb[20].mxu0 }
 0x5e7   : > { %967 = vrot.lane.b32.xlu0 %v952_v55, %s1804_s28  ;;  %v1477_v56 = vpop.f32.mrb[21].mxu0 }
 0x5e8   : > { %v955_v57 = vpop.f32.mrb[22].mxu0 }
 0x5e9   : > { %v1478_v58 = vpop.f32.mrb[23].mxu0 }
 0x649   : > { %v960_v59 = vpop.permute.xlu0 %959 }
 0x64a   : > { %v970_v61 = vsel %vm515_vm2, %v618_v41, %v960_v59 }
 0x651   : > { %v964_v60 = vpop.permute.xlu1 %963 }
 0x652   : > { %v972_v62 = vsel %vm971_vm4, %v970_v61, %v964_v60 }
 0x659   : > { %v968_v63 = vpop.permute.xlu0 %967 }
 0x65a   : > { %v974_v1 = vsel %vm973_vm5, %v972_v62, %v968_v63 }
 0x65b   : > { %v975_v2 = vpack.c.bf16 %v974_v1, %v974_v1 }
 0x65d   : > { %1484 = vmatmul.mubr.msk.bf16.vlgmr.msra.gmra.mrb[12].mxu1 %vm422_vm0, %v975_v2 }
 0x65e   : > { %1499 = vmatprep.mubr.msk.bf16.mxu1 %vm1792_vm1, %v1791_v4  ;;  %1488 = vmatpush3.bf16.msra.mxu1 %v1598_v23 }
 0x65f   : > { %1489 = vmatprep.subr.bf16.mxu1 %v1791_v4 }
 0x662   : > { %1490 = vmatpush3.bf16.msra.mxu1 %v1599_v24 }
 0x663   : > { %1491 = vmatprep.subr.bf16.mxu1 %v1791_v4 }
 0x666   : > { %1492 = vmatpush3.bf16.msra.mxu1 %v1600_v25 }
 0x667   : > { %1493 = vmatprep.subr.bf16.mxu1 %v1791_v4 }
 0x66a   : > { %1494 = vmatpush3.bf16.msra.mxu1 %v1601_v26 }
 0x66b   : > { %1495 = vmatprep.subr.bf16.mxu1 %v1791_v4 }
 0x66e   : > { %1496 = vmatpush3.bf16.msra.mxu1 %v1602_v27 }
 0x66f   : > { %1497 = vmatprep.subr.bf16.mxu1 %v1791_v4 }
 0x672   : > { %1498 = vmatpush3.bf16.msra.mxu1 %v1603_v28 }
 0x730   : > { %v1029_v3 = vpop.f32.mrb[12].mxu1 }
 0x731   : > { %v2132_v5 = vadd.f32 %v1029_v3, %v2043_v0  ;;  %v1485_v6 = vpop.f32.mrb[13].mxu1  ;;  %v1595_v0 = vld [vmem:[%s2239_s8 + $0x10] ss:$8 sps:$4 sm:$0xff]  }
 0x732   : > { %v1032_v7 = vpop.f32.mrb[14].mxu1  ;;  %1083 = vmatpush1.bf16.msra.mxu0 %v1595_v0 }
 0x733   : > { %v1486_v8 = vpop.f32.mrb[15].mxu1  ;;  %v1036_v9 = vmul.f32 %v2132_v5, %v2132_v5 }
 0x735   : > { %v1037_v10 = vsel %vm422_vm0, %v1036_v9, 0.0 }
 0x736   : > { %1038 = vadd.xlane.f32.xlu1 %v1037_v10 }
 0x7c3   : > { %v1039_v15 = vpop.xlane.xlu1 %1038 }
 0x7c4   : > { %v1040_v16 = vmul.f32 0.03125, %v1039_v15 }
 0x7c6   : > { %v1041_v17 = vadd.f32 1e-05, %v1040_v16 }
 0x7c8   : > { %1622 = vrsqrt.f32 %v1041_v17 }
 0x7d2   : > { %v1623_v18 = vpop.eup %1622 }
 0x7d3   : > { %v1043_v20 = vmul.f32 %v1623_v18, %v2132_v5 }
 0x7d5   : > { %v1051_v21 = vmul.f32 %v1376_v19, %v1043_v20 }
 0x7d7   : > { %v1052_v22 = vpack.c.bf16 %v1051_v21, %v1051_v21 }
 0x7d9   : > { %1381 = vmatmul.mubr.msk.bf16.vlgmr.msra.gmra.mrb[24].mxu0 %vm422_vm0, %v1052_v22 }
 0x8ac   : > { %v1114_v29 = vpop.f32.mrb[24].mxu0 }
 0x8ad   : > { %1130 = vrot.lane.b32.xlu0 %v1114_v29, %s1793_s2  ;;  %v1116_v30 = vpop.f32.mrb[25].mxu0  ;;  %v1382_v33 = vmul.f32 -1.442695, %v1114_v29 }
 0x8ae   : > { %v1118_v31 = vpop.f32.mrb[26].mxu0 }
 0x8af   : > { %v1119_v32 = vpop.f32.mrb[27].mxu0  ;;  %1624 = vpow2.f32 %v1382_v33 }
 0x8b1   : > { %1132 = vrot.lane.b32.xlu0 %v1116_v30, %s1793_s2  ;;  %s1391_s2 = sshll.u32 %s1883_s17, 7  ;;  %s1233_s17 = scalar_lea.sflag [#allocation4], %s2024_s7 }
 0x8b2   : > { %s2186_s23 = scalar_lea.hbm %s2241_s10, %s1391_s2 }
 0x8b9   : > { %v1625_v34 = vpop.eup %1624 }
 0x8ba   : > { %v1124_v35 = vadd.f32 1.0, %v1625_v34 }
 0x8bc   : > { %1626 = vrcp.f32 %v1124_v35 }
 0x8c6   : > { %v1627_v36 = vpop.eup %1626 }
 0x8c7   : > { %v1127_v37 = vmul.f32 %v1627_v36, %v1114_v29 }
 0x91f   : > { %v1131_v4 = vpop.permute.xlu0 %1130 }
 0x923   : > { %v1133_v38 = vpop.permute.xlu0 %1132 }
 0x924   : > { %v1134_v39 = vsel %vm422_vm0, %v1131_v4, %v1133_v38 }
 0x925   : > { %v1136_v40 = vmul.f32 %v1134_v39, %v1127_v37 }
 0x927   : > { %v1137_v41 = vpack.c.bf16 %v1136_v40, %v1136_v40 }
 0x929   : > { %1500 = vmatmul.mubr.msk.bf16.vlgmr.msra.gmra.mrb[16].mxu1 %vm1186_vm6, %v1137_v41 }
 0x9fc   : > { %v1224_v42 = vpop.f32.mrb[16].mxu1 }
 0x9fd   : > { %v1230_v43 = vadd.f32 %v1224_v42, %v2132_v5  ;;  %v1501_v44 = vpop.f32.mrb[17].mxu1 }
 0x9fe   : > { %v1227_v45 = vpop.f32.mrb[18].mxu1 }
 0x9ff   : > { %v1502_v46 = vpop.f32.mrb[19].mxu1  ;;  %1231 = vst.msk [vmem:[%s414_s11] sm:$0xff] %vm422_vm0, %v1230_v43 }
 0xa00   : > { %1727 = shalt.err (!%p1724_p10)
}
 0xa01   : > { %s1728_s7 = scalar_lea.hbm %s2186_s23, 128  ;;  %s1732_s2 = scalar_lea.hbm %s2241_s10, 256 }
 0xa02   : > { %p1729_p13 = scmp.ne.s32.totalorder %s2186_s23, %s1728_s7  ;;  %p1733_p11 = scmp.lt.u32.totalorder %s2186_s23, %s2241_s10 }
 0xa03   : > { %p1734_p9 = scmp.lt.u32.totalorder %s1732_s2, %s1728_s7  ;;  %p1736_p1 = scmp.lt.u32.totalorder %s1728_s7, %s2186_s23 }
 0xa04   : > { %p1730_p5 = pnand %p1729_p13, %p1975_p4 }
 0xa05   : > { %p1735_p2 = por %p1734_p9, %p1733_p11 }
 0xa06   : > { %p1731_p0 = pneg %p1730_p5 }
 0xa07   : > { %p1737_p6 = por %p1736_p1, %p1735_p2 }
 0xa09   : > { %p1738_p8 = pnand %p1737_p6, %p1731_p0 }
 0xa0b   : > { %1741 = shalt.err (!%p1738_p8)
}
 0xa0c   : > { %1513 = dma.vmem_to_hbm [thread:$0]  (%p1975_p4), %s2188_s19, 128, %s2186_s23, %s1233_s17  }
 0xa0d PF: > { %s1258_s26 = sand.u32 1, %s1772_s13   ;;  %p2260_p12 = scmp.ne.s32.totalorder %s2248_s20, 0 }
 0xa0e   : > { %p2261_p3 = scmp.ge.s32.totalorder %s1784_s16, 2  ;;  %s1259_s27 = scalar_lea.sflag [#allocation4], %s1258_s26 }
 0xa10   : > { %p1527_p7 = pnand %p2261_p3, %p2260_p12 }
 0xa12   : > { %1767 = dma.done.wait (!%p1527_p7), %s1259_s27, 128  }
 0xa13   : > { %1769 = vsyncadd (!%p1527_p7), %s1259_s27, 4294967168  ;;  %p24_p10 = scmp.ge.s32.totalorder %s1965_s30, 4   ;;  %s2262_s13 = smov %s1776_s14 }
 0xa14   : > { %s2263_s14 = smov %s1780_s15  ;;  %s2264_s15 = smov %s1981_s22 }
 0xa15   : > { %s2265_s16 = smov %s1965_s30  ;;  %26 = sbr.rel (!%p24_p10) target bundleno = 9 (0x9), region = 116 }
 0xa1c   :  { %1264 = vsyncpa [#allocation3], 1 }
 0xa1d   :  { %1266 = vsyncpa [#allocation3 + $0x1], 1 }
 0xa1e   :  { %1267 = vsyncpa [#allocation6], 1 }
 0xa1f   :  { %1268 = vsyncpa [#allocation4], 1 }
 0xa20   :  { %1270 = vsyncpa [#allocation4 + $0x1], 1 }

</bundles_post_ra>
